<compile_context>
chip_gen: v6e
topology: v6e:2x2x1
jax: 0.10.0
libtpu: 0.0.40
codegen_flags: <defaults>
</compile_context>

<pallas_src>
import jax
import jax.numpy as jnp
from jax.experimental import pallas as pl
from jax.experimental.pallas import tpu as pltpu

LANE = 128      # pad matmul N / channel dims to multiples of this
SUBLANE = 8     # f32 sublane packing: output tiles are (8, 128)


def _round_up(x, m):
    return m * pl.cdiv(x, m)


# ----------------------------------------------------------------------------
# Fused Pallas kernel: conv(as matmul)+bias+ReLU -> per-image avg-pool -> FC
# One grid step == Bt images; everything stays VMEM-resident.
# ----------------------------------------------------------------------------
def _fused_cnn_kernel(patches_ref, wc_ref, bc_ref, pool_ref, wf_ref, bf_ref,
                      logits_ref):
    # conv as im2col matmul (bf16 in, f32 acc) + bias + ReLU
    feat = jnp.dot(patches_ref[...], wc_ref[...],
                   preferred_element_type=jnp.float32)           # (Bt*HW, Cp)
    feat = jnp.maximum(feat + bc_ref[...], 0.0)

    # per-image global average pool as an MXU matmul against a resident
    # block-structured 1/HW matrix: (POOL_ROWS, Bt*HW) @ (Bt*HW, Cp)
    pooled = jnp.dot(pool_ref[...], feat.astype(jnp.bfloat16),
                     preferred_element_type=jnp.float32)         # (POOL_ROWS, Cp)

    # FC head: (POOL_ROWS, Cp) @ (Cp, Np) + bias -> dense (8,128)-tile store
    logits = jnp.dot(pooled.astype(jnp.bfloat16), wf_ref[...],
                     preferred_element_type=jnp.float32) + bf_ref[...]
    logits_ref[...] = logits


def _choose_batch_tile(B, HW, K, Cp, max_bytes=6 << 20):
    """Largest divisor Bt of B whose per-step working set fits a conservative
    VMEM budget (safe for v5e's 16 MiB scoped default and v7x's 64 MiB VMEM)."""
    best = 1
    for bt in range(1, B + 1):
        if B % bt:
            continue
        patches_blk = 2 * bt * HW * K * 2          # bf16, double-buffered
        feat_blk = bt * HW * Cp * 4                # f32 intermediate
        pool_blk = _round_up(bt, SUBLANE) * bt * HW * 2
        if patches_blk + feat_blk + pool_blk <= max_bytes:
            best = bt
    return best


def fused_cnn_pallas(patches_flat, wc_p, bc_p, pool_mat, wf_p, bf_p,
                     B, HW, Bt, pool_rows):
    K = patches_flat.shape[-1]
    Cp = wc_p.shape[-1]
    Np = wf_p.shape[-1]
    n_steps = B // Bt

    flops = (2 * B * HW * K * Cp                       # conv matmul
             + 2 * n_steps * pool_rows * Bt * HW * Cp  # pool matmul
             + 2 * n_steps * pool_rows * Cp * Np)      # fc matmul
    bytes_accessed = (2 * (patches_flat.size + wc_p.size + pool_mat.size
                           + wf_p.size)                # bf16 inputs
                      + 4 * (bc_p.size + bf_p.size)    # f32 biases
                      + 4 * n_steps * pool_rows * Np)  # f32 logits out

    logits_pad = pl.pallas_call(
        _fused_cnn_kernel,
        out_shape=jax.ShapeDtypeStruct((n_steps * pool_rows, Np), jnp.float32),
        grid=(n_steps,),
        in_specs=[
            pl.BlockSpec((Bt * HW, K), lambda i: (i, 0)),       # patch rows / step
            pl.BlockSpec((K, Cp), lambda i: (0, 0)),            # conv weight (resident)
            pl.BlockSpec((1, Cp), lambda i: (0, 0)),            # conv bias
            pl.BlockSpec((pool_rows, Bt * HW), lambda i: (0, 0)),  # pooling matrix
            pl.BlockSpec((Cp, Np), lambda i: (0, 0)),           # fc weight
            pl.BlockSpec((1, Np), lambda i: (0, 0)),            # fc bias
        ],
        out_specs=pl.BlockSpec((pool_rows, Np), lambda i: (i, 0)),
        compiler_params=pltpu.CompilerParams(
            dimension_semantics=("parallel",)),
        cost_estimate=pl.CostEstimate(flops=flops, transcendentals=0,
                                      bytes_accessed=bytes_accessed),
    )(patches_flat, wc_p, bc_p, pool_mat, wf_p, bf_p)
    return logits_pad


# ----------------------------------------------------------------------------
# JAX glue: im2col + lane padding (layout plumbing only; no hot compute)
# ----------------------------------------------------------------------------
def _im2col_3x3_same(x_nhwc):
    """3x3 'SAME' patches: (B,H,W,Cin) -> (B, H*W, 9*Cin), (dy,dx) major."""
    B, H, W, C = x_nhwc.shape
    xp = jnp.pad(x_nhwc, ((0, 0), (1, 1), (1, 1), (0, 0)))
    cols = [xp[:, dy:dy + H, dx:dx + W, :] for dy in range(3) for dx in range(3)]
    patches = jnp.concatenate(cols, axis=-1)          # (B, H, W, 9*C)
    return patches.reshape(B, H * W, 9 * C)


def small_cnn_model(x_nchw, params):
    """The wrapped 'model': returns a tuple whose first element is the logits.
    (The pooled-features auxiliary output was dropped per perf review: it is
    discarded by ModelWrapper anyway, and emitting it cost an extra HBM
    writeback per grid step.)"""
    w_conv, b_conv, w_fc, b_fc = params
    B, Cin, H, W = x_nchw.shape
    HW = H * W
    K = 9 * Cin
    Cmid = w_conv.shape[-1]
    Ncls = w_fc.shape[-1]
    Cp = _round_up(Cmid, LANE)
    Np = _round_up(Ncls, LANE)

    Bt = _choose_batch_tile(B, HW, K, Cp)
    pool_rows = _round_up(Bt, SUBLANE)

    x_nhwc = jnp.transpose(x_nchw, (0, 2, 3, 1))      # NCHW -> NHWC
    patches = _im2col_3x3_same(x_nhwc)                # (B, HW, K) -- K NOT padded
    patches_flat = patches.reshape(B * HW, K).astype(jnp.bfloat16)

    # Zero-pad channel / class dims to 128 lanes (zeros contribute nothing).
    wc_p = jnp.pad(w_conv, ((0, 0), (0, Cp - Cmid))).astype(jnp.bfloat16)
    bc_p = jnp.pad(b_conv, ((0, 0), (0, Cp - Cmid)))                  # f32
    wf_p = jnp.pad(w_fc, ((0, Cp - Cmid), (0, Np - Ncls))).astype(jnp.bfloat16)
    bf_p = jnp.pad(b_fc, ((0, 0), (0, Np - Ncls)))                    # f32

    # Block-structured per-image averaging matrix, built once (resident input,
    # constant index_map) instead of a per-step in-kernel splat.
    row_ids = jnp.arange(pool_rows)[:, None]                  # (pool_rows, 1)
    col_img = jnp.arange(Bt * HW)[None, :] // HW              # (1, Bt*HW)
    pool_mat = jnp.where(row_ids == col_img, 1.0 / HW, 0.0).astype(jnp.bfloat16)

    logits_pad = fused_cnn_pallas(patches_flat, wc_p, bc_p, pool_mat, wf_p,
                                  bf_p, B, HW, Bt, pool_rows)
    logits = logits_pad.reshape(B // Bt, pool_rows, Np)[:, :Bt, :Ncls]
    logits = logits.reshape(B, Ncls)                  # (B, num_classes)
    return (logits,)


def model_wrapper_forward(x_nchw, params):
    """ModelWrapper.forward: run model, take first element if tuple/list/dict."""
    o = small_cnn_model(x_nchw, params)
    if isinstance(o, (tuple, list, dict)):
        o = o[0] if isinstance(o, (tuple, list)) else next(iter(o.values()))
    return o


# ----------------------------------------------------------------------------
# Parameters + pure-JAX reference (for a correctness check)
# ----------------------------------------------------------------------------
def make_params(cin=4, cmid=8, num_classes=10):
    k0, k1, k2, k3 = jax.random.split(jax.random.PRNGKey(42), 4)
    # (kh, kw, Cin, Cout) flattened to (9*Cin, Cout), matching im2col ordering.
    w_conv = (0.1 * jax.random.normal(k0, (3, 3, cin, cmid), jnp.float32)
              ).reshape(9 * cin, cmid)
    b_conv = 0.1 * jax.random.normal(k1, (1, cmid), jnp.float32)
    w_fc = 0.1 * jax.random.normal(k2, (cmid, num_classes), jnp.float32)
    b_fc = 0.1 * jax.random.normal(k3, (1, num_classes), jnp.float32)
    return (w_conv, b_conv, w_fc, b_fc)


def _reference_forward(x_nchw, params):
    w_conv, b_conv, w_fc, b_fc = params
    x_nhwc = jnp.transpose(x_nchw, (0, 2, 3, 1))
    patches = _im2col_3x3_same(x_nhwc)                        # (B, HW, 9*Cin)
    feat = jnp.maximum(
        jnp.einsum("bmk,kc->bmc", patches, w_conv,
                   precision=jax.lax.Precision.HIGHEST) + b_conv, 0.0)
    pooled = jnp.mean(feat, axis=1)                           # (B, Cmid)
    return jnp.dot(pooled, w_fc,
                   precision=jax.lax.Precision.HIGHEST) + b_fc


# ----------------------------------------------------------------------------
if __name__ == "__main__":
    B, Cin, H, W = 2, 4, 16, 16
    x = jax.random.normal(jax.random.PRNGKey(0), (B, Cin, H, W), jnp.float32)
    params = make_params(cin=Cin, cmid=8, num_classes=10)

    fwd = jax.jit(model_wrapper_forward)
    out = jax.block_until_ready(fwd(x, params))

    assert out.shape == (B, 10), out.shape
    assert out.dtype == jnp.float32

    ref = _reference_forward(x, params)
    # bf16 MXU inputs with f32 accumulation -> loose-ish tolerance.
    assert jnp.allclose(out, ref, rtol=5e-2, atol=5e-2), \
        float(jnp.max(jnp.abs(out - ref)))
    print("KERNEL_OK")
</pallas_src>

<mosaic_0001>
module attributes {stable_mosaic.version = 11 : i64} {
  func.func @_fused_cnn_kernel(%arg0: i32, %arg1: memref<512x36xbf16, #tpu.memory_space<vmem>>, %arg2: memref<36x128xbf16, #tpu.memory_space<vmem>>, %arg3: memref<1x128xf32, #tpu.memory_space<vmem>>, %arg4: memref<8x512xbf16, #tpu.memory_space<vmem>>, %arg5: memref<128x128xbf16, #tpu.memory_space<vmem>>, %arg6: memref<1x128xf32, #tpu.memory_space<vmem>>, %arg7: memref<8x128xf32, #tpu.memory_space<vmem>>) attributes {dimension_semantics = [#tpu.dimension_semantics<parallel>], iteration_bounds = array<i64: 1>, scalar_prefetch = 0 : i64, scratch_operands = 0 : i64, tpu.core_type = #tpu.core_type<tc>, window_params = [{transform_indices = @transform_0, window_bounds = array<i64: 512, 36>}, {pipeline_mode = #tpu.pipeline_mode<synchronous>, transform_indices = @transform_1, window_bounds = array<i64: 36, 128>}, {pipeline_mode = #tpu.pipeline_mode<synchronous>, transform_indices = @transform_2, window_bounds = array<i64: 1, 128>}, {pipeline_mode = #tpu.pipeline_mode<synchronous>, transform_indices = @transform_3, window_bounds = array<i64: 8, 512>}, {pipeline_mode = #tpu.pipeline_mode<synchronous>, transform_indices = @transform_4, window_bounds = array<i64: 128, 128>}, {pipeline_mode = #tpu.pipeline_mode<synchronous>, transform_indices = @transform_5, window_bounds = array<i64: 1, 128>}, {transform_indices = @transform_6, window_bounds = array<i64: 8, 128>}]} {
    %c0 = arith.constant 0 : index
    %c0_0 = arith.constant 0 : index
    %0 = vector.load %arg1[%c0, %c0_0] : memref<512x36xbf16, #tpu.memory_space<vmem>>, vector<512x36xbf16>
    %c0_1 = arith.constant 0 : index
    %c0_2 = arith.constant 0 : index
    %1 = vector.load %arg2[%c0_1, %c0_2] : memref<36x128xbf16, #tpu.memory_space<vmem>>, vector<36x128xbf16>
    %cst = arith.constant dense<0.000000e+00> : vector<512x128xf32>
    %2 = tpu.matmul %0, %1, %cst {dimension_numbers = #tpu.dot_dimension_numbers<[1], [0], [0], [1], [0, 0, 1, 1], [], []>} : vector<512x36xbf16>, vector<36x128xbf16>, vector<512x128xf32> -> vector<512x128xf32>
    %c0_3 = arith.constant 0 : index
    %c0_4 = arith.constant 0 : index
    %3 = vector.load %arg3[%c0_3, %c0_4] : memref<1x128xf32, #tpu.memory_space<vmem>>, vector<1x128xf32>
    %4 = vector.broadcast %3 : vector<1x128xf32> to vector<512x128xf32>
    %5 = arith.addf %2, %4 : vector<512x128xf32>
    %cst_5 = arith.constant 0.000000e+00 : f32
    %6 = vector.broadcast %cst_5 : f32 to vector<512x128xf32>
    %7 = arith.maximumf %5, %6 : vector<512x128xf32>
    %c0_6 = arith.constant 0 : index
    %c0_7 = arith.constant 0 : index
    %8 = vector.load %arg4[%c0_6, %c0_7] : memref<8x512xbf16, #tpu.memory_space<vmem>>, vector<8x512xbf16>
    %9 = arith.truncf %7 : vector<512x128xf32> to vector<512x128xbf16>
    %cst_8 = arith.constant dense<0.000000e+00> : vector<8x128xf32>
    %10 = tpu.matmul %8, %9, %cst_8 {dimension_numbers = #tpu.dot_dimension_numbers<[1], [0], [0], [1], [0, 0, 1, 1], [], []>} : vector<8x512xbf16>, vector<512x128xbf16>, vector<8x128xf32> -> vector<8x128xf32>
    %11 = arith.truncf %10 : vector<8x128xf32> to vector<8x128xbf16>
    %c0_9 = arith.constant 0 : index
    %c0_10 = arith.constant 0 : index
    %12 = vector.load %arg5[%c0_9, %c0_10] : memref<128x128xbf16, #tpu.memory_space<vmem>>, vector<128x128xbf16>
    %cst_11 = arith.constant dense<0.000000e+00> : vector<8x128xf32>
    %13 = tpu.matmul %11, %12, %cst_11 {dimension_numbers = #tpu.dot_dimension_numbers<[1], [0], [0], [1], [0, 0, 1, 1], [], []>} : vector<8x128xbf16>, vector<128x128xbf16>, vector<8x128xf32> -> vector<8x128xf32>
    %c0_12 = arith.constant 0 : index
    %c0_13 = arith.constant 0 : index
    %14 = vector.load %arg6[%c0_12, %c0_13] : memref<1x128xf32, #tpu.memory_space<vmem>>, vector<1x128xf32>
    %15 = vector.broadcast %14 : vector<1x128xf32> to vector<8x128xf32>
    %16 = arith.addf %13, %15 : vector<8x128xf32>
    %c0_14 = arith.constant 0 : index
    %c0_15 = arith.constant 0 : index
    %17 = vector.load %arg7[%c0_14, %c0_15] : memref<8x128xf32, #tpu.memory_space<vmem>>, vector<8x128xf32>
    tpu.vector_store %arg7[%c0_14, %c0_15], %16 {strides = array<i32>} : memref<8x128xf32, #tpu.memory_space<vmem>>, vector<8x128xf32>,
    return
  }
  func.func @transform_0(%arg0: i32) -> (i32, i32) {
    %c0_i32 = arith.constant 0 : i32
    %c0_i32_0 = arith.constant 0 : i32
    return %arg0, %c0_i32 : i32, i32
  }
  func.func @transform_1(%arg0: i32) -> (i32, i32) {
    %c0_i32 = arith.constant 0 : i32
    %c0_i32_0 = arith.constant 0 : i32
    %c0_i32_1 = arith.constant 0 : i32
    return %c0_i32, %c0_i32_0 : i32, i32
  }
  func.func @transform_2(%arg0: i32) -> (i32, i32) {
    %c0_i32 = arith.constant 0 : i32
    %c0_i32_0 = arith.constant 0 : i32
    %c0_i32_1 = arith.constant 0 : i32
    return %c0_i32, %c0_i32_0 : i32, i32
  }
  func.func @transform_3(%arg0: i32) -> (i32, i32) {
    %c0_i32 = arith.constant 0 : i32
    %c0_i32_0 = arith.constant 0 : i32
    %c0_i32_1 = arith.constant 0 : i32
    return %c0_i32, %c0_i32_0 : i32, i32
  }
  func.func @transform_4(%arg0: i32) -> (i32, i32) {
    %c0_i32 = arith.constant 0 : i32
    %c0_i32_0 = arith.constant 0 : i32
    %c0_i32_1 = arith.constant 0 : i32
    return %c0_i32, %c0_i32_0 : i32, i32
  }
  func.func @transform_5(%arg0: i32) -> (i32, i32) {
    %c0_i32 = arith.constant 0 : i32
    %c0_i32_0 = arith.constant 0 : i32
    %c0_i32_1 = arith.constant 0 : i32
    return %c0_i32, %c0_i32_0 : i32, i32
  }
  func.func @transform_6(%arg0: i32) -> (i32, i32) {
    %c0_i32 = arith.constant 0 : i32
    %c0_i32_0 = arith.constant 0 : i32
    return %arg0, %c0_i32 : i32, i32
  }
}

</mosaic_0001>

<bundles_post_ra>
// kernel: model_wrapper_forward.1
= control target key start
LH: loop header
LB: loop body
LE: loop exit
PB: predicated region body
PF: predicated region fallthrough
CT: control target
= control target key end

     0   :  { %vm372_vm0 = vcmask 1041408   ;;  %vm275_vm1 = vcmask 293888   ;;  %vm1284_vm2 = vmmov 0   ;;  %s1640_s1 = inlined_call_operand.vmem [shape: bf16[36,128], index: 1, kind: input, shape index: {}]   ;;  %s1641_s0 = inlined_call_operand.vmem [shape: bf16[512,36], index: 0, kind: input, shape index: {}]   ;;  %s1642_s3 = inlined_call_operand.vmem [shape: bf16[8,512], index: 3, kind: input, shape index: {}]   ;;  %s1643_s2 = inlined_call_operand.vmem [shape: f32[1,128], index: 2, kind: input, shape index: {}]   ;;  %s1644_s4 = inlined_call_operand.vmem [shape: bf16[128,128], index: 4, kind: input, shape index: {}]   ;;  %s1645_s5 = inlined_call_operand.vmem [shape: f32[1,128], index: 5, kind: input, shape index: {}]   ;;  %s1646_s6 = inlined_call_operand.vmem [shape: f32[8,128], index: 6, kind: output, shape index: {}]  }
   0x1   :  { %v1236_v0 = vld [vmem:[%s1640_s1 + $0x10] ss:$0 sps:$4 sm:$0x33]   ;;  %v1237_v1 = vld [vmem:[%s1640_s1 + $0x8] sm:$0xff]   ;;  %v1239_v3 = vld [vmem:[%s1641_s0] sm:$0xff]  }
   0x2   :  { %1233 = vmatprep.subr.msk.bf16.mxu0 %vm372_vm0, %v1236_v0  ;;  %v374_v2 = vsel %vm372_vm0, %v1236_v0, 0  ;;  %v1238_v4 = vld [vmem:[%s1640_s1] sm:$0xff]   ;;  %1149 = vmatprep.mubr.msk.bf16.mxu0 %vm275_vm1, %v1239_v3  ;;  %v1240_v5 = vld [vmem:[%s1641_s0 + $0x8] sm:$0xff]   ;;  %v1241_v6 = vld [vmem:[%s1641_s0 + $0x10] sm:$0xff]  }
   0x3   :  { %1144 = vmatpush3.bf16.msra.mxu0 %v374_v2  ;;  %v1242_v7 = vld [vmem:[%s1641_s0 + $0x18] sm:$0xff]   ;;  %v1243_v8 = vld [vmem:[%s1641_s0 + $0x20] sm:$0xff]   ;;  %v1244_v9 = vld [vmem:[%s1641_s0 + $0x28] sm:$0xff]  }
   0x4   :  { %1145 = vmatprep.subr.bf16.mxu0 %v1237_v1  ;;  %v1245_v10 = vld [vmem:[%s1641_s0 + $0x30] sm:$0xff]   ;;  %v1246_v11 = vld [vmem:[%s1641_s0 + $0x38] sm:$0xff]   ;;  %v1247_v12 = vld [vmem:[%s1641_s0 + $0x40] sm:$0xff]  }
   0x5   :  { %v1248_v13 = vld [vmem:[%s1641_s0 + $0x48] sm:$0xff]   ;;  %v1249_v14 = vld [vmem:[%s1641_s0 + $0x50] sm:$0xff]   ;;  %v1250_v15 = vld [vmem:[%s1641_s0 + $0x58] sm:$0xff]  }
   0x6   :  { %v1251_v16 = vld [vmem:[%s1641_s0 + $0x60] sm:$0xff]   ;;  %v1252_v17 = vld [vmem:[%s1641_s0 + $0x68] sm:$0xff]   ;;  %v1253_v18 = vld [vmem:[%s1641_s0 + $0x70] sm:$0xff]  }
   0x7   :  { %1146 = vmatpush3.bf16.msra.mxu0 %v1237_v1  ;;  %v1254_v19 = vld [vmem:[%s1641_s0 + $0x78] sm:$0xff]   ;;  %v1255_v20 = vld [vmem:[%s1641_s0 + $0x80] sm:$0xff]   ;;  %v1256_v21 = vld [vmem:[%s1641_s0 + $0x88] sm:$0xff]  }
   0x8   :  { %1147 = vmatprep.subr.bf16.mxu0 %v1238_v4  ;;  %v1257_v22 = vld [vmem:[%s1641_s0 + $0x90] sm:$0xff]   ;;  %v1258_v23 = vld [vmem:[%s1641_s0 + $0x98] sm:$0xff]   ;;  %v1259_v24 = vld [vmem:[%s1641_s0 + $0xa0] sm:$0xff]  }
   0x9   :  { %v1260_v25 = vld [vmem:[%s1641_s0 + $0xa8] sm:$0xff]   ;;  %v1261_v26 = vld [vmem:[%s1641_s0 + $0xb0] sm:$0xff]   ;;  %v1262_v27 = vld [vmem:[%s1641_s0 + $0xb8] sm:$0xff]  }
   0xa   :  { %v1263_v28 = vld [vmem:[%s1641_s0 + $0xc0] sm:$0xff]   ;;  %v1264_v29 = vld [vmem:[%s1641_s0 + $0xc8] sm:$0xff]   ;;  %v1265_v30 = vld [vmem:[%s1641_s0 + $0xd0] sm:$0xff]  }
   0xb   :  { %1148 = vmatpush3.bf16.msra.mxu0 %v1238_v4  ;;  %v1266_v31 = vld [vmem:[%s1641_s0 + $0xd8] sm:$0xff]   ;;  %v1267_v32 = vld [vmem:[%s1641_s0 + $0xe0] sm:$0xff]   ;;  %v1268_v33 = vld [vmem:[%s1641_s0 + $0xe8] sm:$0xff]  }
   0xc   :  { %v1269_v34 = vld [vmem:[%s1641_s0 + $0xf0] sm:$0xff]   ;;  %v1270_v35 = vld [vmem:[%s1641_s0 + $0xf8] sm:$0xff]   ;;  %v1460_v36 = vld [vmem:[%s1642_s3] sm:$0xff] }
   0xd   :  { %v1043_v37 = vcombine.high %v1460_v36, %v1460_v36  ;;  %v1467_v39 = vld [vmem:[%s1643_s2] ss:$0 sm:$0xff] }
   0xe   :  { %1150 = vmatmul.mubr.msk.bf16.vlgmr.msra.gmra.mxu0 %vm275_vm1, %v1240_v5 }
   0xf   :  { %1153 = vmatprep.mubr.msk.bf16.mxu0 %vm275_vm1, %v1241_v6  ;;  %809 = vmatprep.mubr.bf16.mxu1 %v1043_v37 }
  0x16   :  { %1154 = vmatmul.mubr.msk.bf16.gmra.mxu0 %vm275_vm1, %v1242_v7 }
  0x17   :  { %1157 = vmatprep.mubr.msk.bf16.mxu0 %vm275_vm1, %v1243_v8 }
  0x1e   :  { %1158 = vmatmul.mubr.msk.bf16.gmra.mxu0 %vm275_vm1, %v1244_v9 }
  0x1f   :  { %1161 = vmatprep.mubr.msk.bf16.mxu0 %vm275_vm1, %v1245_v10 }
  0x26   :  { %1162 = vmatmul.mubr.msk.bf16.gmra.mxu0 %vm275_vm1, %v1246_v11 }
  0x27   :  { %1165 = vmatprep.mubr.msk.bf16.mxu0 %vm275_vm1, %v1247_v12 }
  0x2e   :  { %1166 = vmatmul.mubr.msk.bf16.gmra.mxu0 %vm275_vm1, %v1248_v13 }
  0x2f   :  { %1169 = vmatprep.mubr.msk.bf16.mxu0 %vm275_vm1, %v1249_v14 }
  0x36   :  { %1170 = vmatmul.mubr.msk.bf16.gmra.mxu0 %vm275_vm1, %v1250_v15 }
  0x37   :  { %1173 = vmatprep.mubr.msk.bf16.mxu0 %vm275_vm1, %v1251_v16 }
  0x3e   :  { %1174 = vmatmul.mubr.msk.bf16.gmra.mxu0 %vm275_vm1, %v1252_v17 }
  0x3f   :  { %1177 = vmatprep.mubr.msk.bf16.mxu0 %vm275_vm1, %v1253_v18 }
  0x46   :  { %1178 = vmatmul.mubr.msk.bf16.gmra.mxu0 %vm275_vm1, %v1254_v19 }
  0x47   :  { %1181 = vmatprep.mubr.msk.bf16.mxu0 %vm275_vm1, %v1255_v20 }
  0x4e   :  { %1182 = vmatmul.mubr.msk.bf16.gmra.mxu0 %vm275_vm1, %v1256_v21 }
  0x4f   :  { %1185 = vmatprep.mubr.msk.bf16.mxu0 %vm275_vm1, %v1257_v22 }
  0x56   :  { %1186 = vmatmul.mubr.msk.bf16.gmra.mxu0 %vm275_vm1, %v1258_v23 }
  0x57   :  { %1189 = vmatprep.mubr.msk.bf16.mxu0 %vm275_vm1, %v1259_v24 }
  0x5e   :  { %1190 = vmatmul.mubr.msk.bf16.gmra.mxu0 %vm275_vm1, %v1260_v25 }
  0x5f   :  { %1193 = vmatprep.mubr.msk.bf16.mxu0 %vm275_vm1, %v1261_v26 }
  0x66   :  { %1194 = vmatmul.mubr.msk.bf16.gmra.mxu0 %vm275_vm1, %v1262_v27 }
  0x67   :  { %1197 = vmatprep.mubr.msk.bf16.mxu0 %vm275_vm1, %v1263_v28 }
  0x6e   :  { %1198 = vmatmul.mubr.msk.bf16.gmra.mxu0 %vm275_vm1, %v1264_v29 }
  0x6f   :  { %1201 = vmatprep.mubr.msk.bf16.mxu0 %vm275_vm1, %v1265_v30 }
  0x76   :  { %1202 = vmatmul.mubr.msk.bf16.gmra.mxu0 %vm275_vm1, %v1266_v31 }
  0x77   :  { %1205 = vmatprep.mubr.msk.bf16.mxu0 %vm275_vm1, %v1267_v32 }
  0x7e   :  { %1206 = vmatmul.mubr.msk.bf16.gmra.mxu0 %vm275_vm1, %v1268_v33 }
  0x7f   :  { %1209 = vmatprep.mubr.msk.bf16.mxu0 %vm275_vm1, %v1269_v34 }
  0x86   :  { %1210 = vmatmul.mubr.msk.bf16.gmra.mxu0 %vm275_vm1, %v1270_v35 }
  0xce   :  { %v1151_v38 = vpop.f32.mrf.mxu0 }
  0xcf   :  { %v419_v41 = vadd.f32 %v1151_v38, %v1467_v39 }
  0xd0   :  { %v410_v40 = vpop.f32.mrf.mxu0 }
  0xd1   :  { %v411_v43 = vadd.f32 %v1467_v39, %v410_v40  ;;  %v667_v46 = vmax.f32 %v419_v41, 0.0 }
  0xd2   :  { %v1152_v42 = vpop.f32.mrf.mxu0 }
  0xd3   :  { %v422_v44 = vadd.f32 %v1152_v42, %v1467_v39  ;;  %v665_v50 = vmax.f32 %v411_v43, 0.0 }
  0xd4   :  { %v413_v45 = vpop.f32.mrf.mxu0 }
  0xd5   :  { %v668_v47 = vmax.f32 %v422_v44, 0.0  ;;  %v414_v48 = vadd.f32 %v1467_v39, %v413_v45 }
  0xd6   :  { %v1155_v49 = vpop.f32.mrf.mxu0 }
  0xd7   :  { %v1473_v51 = vpack.c.bf16 %v668_v47, %v667_v46  ;;  %v666_v52 = vmax.f32 %v414_v48, 0.0  ;;  %v435_v55 = vadd.f32 %v1155_v49, %v1467_v39 }
  0xd8   :  { %v426_v53 = vpop.f32.mrf.mxu0 }
  0xd9   :  { %v1475_v54 = vpack.c.bf16 %v666_v52, %v665_v50  ;;  %v427_v57 = vadd.f32 %v1467_v39, %v426_v53  ;;  %v671_v60 = vmax.f32 %v435_v55, 0.0 }
  0xda   :  { %v1156_v56 = vpop.f32.mrf.mxu0 }
  0xdb   :  { %v438_v58 = vadd.f32 %v1156_v56, %v1467_v39  ;;  %v669_v0 = vmax.f32 %v427_v57, 0.0 }
  0xdc   :  { %v429_v59 = vpop.f32.mrf.mxu0 }
  0xdd   :  { %v672_v61 = vmax.f32 %v438_v58, 0.0  ;;  %v430_v62 = vadd.f32 %v1467_v39, %v429_v59 }
  0xde   :  { %v1159_v63 = vpop.f32.mrf.mxu0 }
  0xdf   :  { %v1481_v1 = vpack.c.bf16 %v672_v61, %v671_v60  ;;  %v670_v2 = vmax.f32 %v430_v62, 0.0  ;;  %v451_v57 = vadd.f32 %v1159_v63, %v1467_v39 }
  0xe0   :  { %v1483_v3 = vpop.f32.mrf.mxu0 }
  0xe1   :  { %v1485_v4 = vpack.c.bf16 %v670_v2, %v669_v0 }
  0xe2   :  { %v1160_v5 = vpop.f32.mrf.mxu0 }
  0xe3   :  { %v454_v44 = vadd.f32 %v1160_v5, %v1467_v39 }
  0xe4   :  { %v445_v6 = vpop.f32.mrf.mxu0 }
  0xe5   :  { %v676_v61 = vmax.f32 %v454_v44, 0.0  ;;  %v446_v5 = vadd.f32 %v1467_v39, %v445_v6 }
  0xe6   :  { %v1163_v7 = vpop.f32.mrf.mxu0 }
  0xe7   :  { %v467_v27 = vadd.f32 %v1163_v7, %v1467_v39 }
  0xe8   :  { %v458_v8 = vpop.f32.mrf.mxu0 }
  0xe9   :  { %v679_v40 = vmax.f32 %v467_v27, 0.0  ;;  %v459_v41 = vadd.f32 %v1467_v39, %v458_v8 }
  0xea   :  { %v1164_v9 = vpop.f32.mrf.mxu0 }
  0xeb   :  { %v470_v24 = vadd.f32 %v1164_v9, %v1467_v39  ;;  %v677_v58 = vmax.f32 %v459_v41, 0.0 }
  0xec   :  { %v461_v10 = vpop.f32.mrf.mxu0 }
  0xed   :  { %v680_v31 = vmax.f32 %v470_v24, 0.0  ;;  %v462_v32 = vadd.f32 %v1467_v39, %v461_v10 }
  0xee   :  { %v1487_v11 = vpop.f32.mrf.mxu0 }
  0xef   :  { %v678_v48 = vmax.f32 %v462_v32, 0.0  ;;  %v738_v52 = vpack.c.bf16 %v680_v31, %v679_v40 }
  0xf0   :  { %v1489_v12 = vpop.f32.mrf.mxu0 }
  0xf1   :  { %v737_v7 = vpack.c.bf16 %v678_v48, %v677_v58 }
  0xf2   :  { %v1491_v13 = vpop.f32.mrf.mxu0 }
  0xf4   :  { %v1493_v14 = vpop.f32.mrf.mxu0 }
  0xf6   :  { %v1171_v15 = vpop.f32.mrf.mxu0 }
  0xf7   :  { %v499_v24 = vadd.f32 %v1171_v15, %v1467_v39 }
  0xf8   :  { %v1495_v16 = vpop.f32.mrf.mxu0 }
  0xfa   :  { %v1172_v17 = vpop.f32.mrf.mxu0 }
  0xfb   :  { %v502_v8 = vadd.f32 %v1172_v17, %v1467_v39 }
  0xfc   :  { %v1497_v18 = vpop.f32.mrf.mxu0 }
  0xfd   :  { %v494_v32 = vadd.f32 %v1467_v39, %v1497_v18  ;;  %v486_v18 = vadd.f32 %v1491_v13, %v1467_v39 }
  0xfe   :  { %v1175_v19 = vpop.f32.mrf.mxu0 }
  0xff   :  { %v515_v42 = vadd.f32 %v1175_v19, %v1467_v39 }
 0x100   :  { %v506_v20 = vpop.f32.mrf.mxu0 }
 0x101   :  { %v691_v59 = vmax.f32 %v515_v42, 0.0  ;;  %v507_v62 = vadd.f32 %v1467_v39, %v506_v20  ;;  %v443_v20 = vadd.f32 %v1467_v39, %v1483_v3 }
 0x102   :  { %v1176_v21 = vpop.f32.mrf.mxu0 }
 0x103   :  { %v518_v33 = vadd.f32 %v1176_v21, %v1467_v39  ;;  %v673_v15 = vmax.f32 %v443_v20, 0.0 }
 0x104   :  { %v509_v22 = vpop.f32.mrf.mxu0 }
 0x105   :  { %v692_v49 = vmax.f32 %v518_v33, 0.0  ;;  %v510_v53 = vadd.f32 %v1467_v39, %v509_v22 }
 0x106   :  { %v1179_v23 = vpop.f32.mrf.mxu0 }
 0x107   :  { %v531_v26 = vadd.f32 %v1179_v23, %v1467_v39  ;;  %v744_v9 = vpack.c.bf16 %v692_v49, %v691_v59  ;;  %v690_v63 = vmax.f32 %v510_v53, 0.0  ;;  %v675_v23 = vmax.f32 %v451_v57, 0.0 }
 0x108   :  { %v522_v25 = vpop.f32.mrf.mxu0  ;;  %v483_v49 = vadd.f32 %v1487_v11, %v1467_v39  ;;  %v478_v57 = vadd.f32 %v1467_v39, %v1493_v14 }
 0x109   :  { %v523_v29 = vadd.f32 %v1467_v39, %v522_v25  ;;  %v695_v35 = vmax.f32 %v531_v26, 0.0  ;;  %v689_v26 = vmax.f32 %v507_v62, 0.0 }
 0x10a   :  { %v1180_v28 = vpop.f32.mrf.mxu0  ;;  %v683_v11 = vmax.f32 %v483_v49, 0.0 }
 0x10b   :  { %v534_v30 = vadd.f32 %v1180_v28, %v1467_v39  ;;  %v693_v45 = vmax.f32 %v523_v29, 0.0  ;;  %v736_v28 = vpack.c.bf16 %v676_v61, %v675_v23  ;;  %v674_v29 = vmax.f32 %v446_v5, 0.0 }
 0x10c   :  { %v525_v34 = vpop.f32.mrf.mxu0  ;;  %v743_v33 = vpack.c.bf16 %v690_v63, %v689_v26  ;;  %v475_v61 = vadd.f32 %v1467_v39, %v1489_v12 }
 0x10d   :  { %v696_v37 = vmax.f32 %v534_v30, 0.0  ;;  %v526_v38 = vadd.f32 %v1467_v39, %v525_v34  ;;  %v688_v30 = vmax.f32 %v502_v8, 0.0  ;;  %v735_v42 = vpack.c.bf16 %v674_v29, %v673_v15 }
 0x10e   :  { %v1183_v43 = vpop.f32.mrf.mxu0 }
 0x10f   :  { %v694_v46 = vmax.f32 %v526_v38, 0.0  ;;  %v746_v47 = vpack.c.bf16 %v696_v37, %v695_v35  ;;  %v547_v56 = vadd.f32 %v1183_v43, %v1467_v39  ;;  %v687_v35 = vmax.f32 %v499_v24, 0.0 }
 0x110   :  { %v538_v50 = vpop.f32.mrf.mxu0  ;;  %v491_v38 = vadd.f32 %v1467_v39, %v1495_v16 }
 0x111   :  { %v745_v55 = vpack.c.bf16 %v694_v46, %v693_v45  ;;  %1090 = vmatprep.subr.bf16.mxu1 %v746_v47  ;;  %v539_v0 = vadd.f32 %v1467_v39, %v538_v50  ;;  %v699_v19 = vmax.f32 %v547_v56, 0.0  ;;  %v742_v43 = vpack.c.bf16 %v688_v30, %v687_v35 }
 0x112   :  { %v1184_v60 = vpop.f32.mrf.mxu0  ;;  %1091 = vmatpush3.bf16.msra.mxu1 %v738_v52  ;;  %v686_v45 = vmax.f32 %v494_v32, 0.0  ;;  %v685_v50 = vmax.f32 %v491_v38, 0.0  ;;  %v684_v56 = vmax.f32 %v486_v18, 0.0 }
 0x113   :  { %v550_v2 = vadd.f32 %v1184_v60, %v1467_v39  ;;  %1092 = vmatprep.subr.bf16.mxu1 %v745_v55  ;;  %v697_v6 = vmax.f32 %v539_v0, 0.0 }
 0x114   :  { %v541_v10 = vpop.f32.mrf.mxu0  ;;  %v741_v58 = vpack.c.bf16 %v686_v45, %v685_v50  ;;  %v740_v0 = vpack.c.bf16 %v684_v56, %v683_v11 }
 0x115   :  { %v700_v21 = vmax.f32 %v550_v2, 0.0  ;;  %v542_v22 = vadd.f32 %v1467_v39, %v541_v10  ;;  %v682_v2 = vmax.f32 %v478_v57, 0.0  ;;  %v1042_v10 = vcombine.low %v1460_v36, %v1460_v36 }
 0x116   :  { %v1187_v25 = vpop.f32.mrf.mxu0  ;;  %1093 = vmatpush3.bf16.msra.mxu1 %v737_v7  ;;  %v681_v7 = vmax.f32 %v475_v61, 0.0 }
 0x117   :  { %v1522_v27 = vpack.c.bf16 %v700_v21, %v699_v19  ;;  %v698_v17 = vmax.f32 %v542_v22, 0.0  ;;  %1094 = vmatprep.subr.bf16.mxu1 %v744_v9  ;;  %v563_v3 = vadd.f32 %v1187_v25, %v1467_v39 }
 0x118   :  { %v554_v31 = vpop.f32.mrf.mxu0  ;;  %v739_v8 = vpack.c.bf16 %v682_v2, %v681_v7 }
 0x119   :  { %v1526_v34 = vpack.c.bf16 %v698_v17, %v697_v6  ;;  %v555_v40 = vadd.f32 %v1467_v39, %v554_v31  ;;  %v703_v46 = vmax.f32 %v563_v3, 0.0 }
 0x11a   :  { %v1188_v37 = vpop.f32.mrf.mxu0  ;;  %1095 = vmatpush3.bf16.msra.mxu1 %v736_v28 }
 0x11b   :  { %v566_v41 = vadd.f32 %v1188_v37, %v1467_v39  ;;  %1096 = vmatprep.subr.bf16.mxu1 %v743_v33  ;;  %v701_v52 = vmax.f32 %v555_v40, 0.0 }
 0x11c   :  { %v557_v44 = vpop.f32.mrf.mxu0 }
 0x11d   :  { %v704_v47 = vmax.f32 %v566_v41, 0.0  ;;  %v558_v48 = vadd.f32 %v1467_v39, %v557_v44 }
 0x11e   :  { %v1538_v16 = vpop.f32.mrf.mxu0  ;;  %1097 = vmatpush3.bf16.msra.mxu1 %v735_v42 }
 0x11f   :  { %v1540_v53 = vpack.c.bf16 %v704_v47, %v703_v46  ;;  %v702_v55 = vmax.f32 %v558_v48, 0.0  ;;  %1098 = vmatprep.subr.bf16.mxu1 %v742_v43  ;;  %v579_v56 = vadd.f32 %v1538_v16, %v1467_v39 }
 0x120   :  { %v1542_v13 = vpop.f32.mrf.mxu0 }
 0x121   :  { %v1546_v59 = vpack.c.bf16 %v702_v55, %v701_v52 }
 0x122   :  { %v1192_v60 = vpop.f32.mrf.mxu0  ;;  %1099 = vmatpush3.bf16.msra.mxu1 %v1481_v1  ;;  %v1558_v1 = vld [vmem:[%s1642_s3 + $0x8] sm:$0xff] }
 0x123   :  { %1100 = vmatprep.subr.bf16.mxu1 %v741_v58  ;;  %v582_v47 = vadd.f32 %v1192_v60, %v1467_v39 }
 0x124   :  { %v1551_v62 = vpop.f32.mrf.mxu0 }
 0x125   :  { %v708_v61 = vmax.f32 %v582_v47, 0.0  ;;  %v574_v60 = vadd.f32 %v1467_v39, %v1551_v62 }
 0x126   :  { %v1195_v5 = vpop.f32.mrf.mxu0  ;;  %1101 = vmatpush3.bf16.msra.mxu1 %v1485_v4  ;;  %v1045_v4 = vcombine.high %v1558_v1, %v1558_v1 }
 0x127   :  { %1102 = vmatprep.subr.bf16.mxu1 %v740_v0  ;;  %v595_v30 = vadd.f32 %v1195_v5, %v1467_v39 }
 0x128   :  { %v586_v14 = vpop.f32.mrf.mxu0 }
 0x129   :  { %v711_v42 = vmax.f32 %v595_v30, 0.0  ;;  %v587_v18 = vadd.f32 %v1467_v39, %v586_v14  ;;  %v707_v14 = vmax.f32 %v579_v56, 0.0 }
 0x12a   :  { %v1196_v9 = vpop.f32.mrf.mxu0  ;;  %1103 = vmatpush3.bf16.msra.mxu1 %v1473_v51 }
 0x12b   :  { %1104 = vmatprep.subr.bf16.mxu1 %v739_v8  ;;  %v598_v17 = vadd.f32 %v1196_v9, %v1467_v39  ;;  %v709_v57 = vmax.f32 %v587_v18, 0.0  ;;  %v571_v8 = vadd.f32 %v1467_v39, %v1542_v13 }
 0x12c   :  { %v589_v12 = vpop.f32.mrf.mxu0 }
 0x12d   :  { %v712_v3 = vmax.f32 %v598_v17, 0.0  ;;  %v590_v15 = vadd.f32 %v1467_v39, %v589_v12  ;;  %v752_v12 = vpack.c.bf16 %v708_v61, %v707_v14 }
 0x12e   :  { %v1562_v63 = vpop.f32.mrf.mxu0  ;;  %1105 = vmatpush3.bf16.msra.mxu1 %v1475_v54 }
 0x12f   :  { %v754_v48 = vpack.c.bf16 %v712_v3, %v711_v42  ;;  %v710_v49 = vmax.f32 %v590_v15, 0.0  ;;  %v611_v17 = vadd.f32 %v1562_v63, %v1467_v39  ;;  %v1281_v3 = vld [vmem:[%s1644_s4 + $0x8] sm:$0xff]   ;;  %v1282_v15 = vld [vmem:[%s1644_s4] sm:$0xff]  }
 0x130   :  { %v1567_v19 = vpop.f32.mrf.mxu0 }
 0x131   :  { %810 = vmatmul.mubr.bf16.vlgmr.msra.gmra.mxu1 %v1042_v10  ;;  %v753_v0 = vpack.c.bf16 %v710_v49, %v709_v57  ;;  %v706_v10 = vmax.f32 %v574_v60, 0.0 }
 0x132   :  { %v1569_v51 = vpop.f32.mrf.mxu0  ;;  %849 = vmatprep.mubr.bf16.mxu1 %v1045_v4 }
 0x133   :  { %v614_v13 = vadd.f32 %v1569_v51, %v1467_v39 }
 0x134   :  { %v1571_v21 = vpop.f32.mrf.mxu0 }
 0x136   :  { %v1203_v22 = vpop.f32.mrf.mxu0 }
 0x137   :  { %v627_v16 = vadd.f32 %v1203_v22, %v1467_v39 }
 0x138   :  { %v618_v23 = vpop.f32.mrf.mxu0 }
 0x13a   :  { %v1204_v20 = vpop.f32.mrf.mxu0 }
 0x13b   :  { %v630_v2 = vadd.f32 %v1204_v20, %v1467_v39  ;;  %v719_v20 = vmax.f32 %v627_v16, 0.0 }
 0x13c   :  { %v621_v24 = vpop.f32.mrf.mxu0 }
 0x13d   :  { %v720_v4 = vmax.f32 %v630_v2, 0.0 }
 0x13e   :  { %v1207_v36 = vpop.f32.mrf.mxu0 }
 0x13f   :  { %v643_v43 = vadd.f32 %v1207_v36, %v1467_v39  ;;  %v622_v36 = vadd.f32 %v1467_v39, %v621_v24  ;;  %v716_v24 = vmax.f32 %v614_v13, 0.0 }
 0x140   :  { %v634_v25 = vpop.f32.mrf.mxu0 }
 0x141   :  { %v723_v58 = vmax.f32 %v643_v43, 0.0  ;;  %v635_v11 = vadd.f32 %v1467_v39, %v634_v25  ;;  %v705_v25 = vmax.f32 %v571_v8, 0.0  ;;  %v718_v22 = vmax.f32 %v622_v36, 0.0 }
 0x142   :  { %v1208_v26 = vpop.f32.mrf.mxu0 }
 0x143   :  { %v646_v37 = vadd.f32 %v1208_v26, %v1467_v39  ;;  %v721_v9 = vmax.f32 %v635_v11, 0.0  ;;  %v619_v26 = vadd.f32 %v1467_v39, %v618_v23  ;;  %v715_v23 = vmax.f32 %v611_v17, 0.0 }
 0x144   :  { %v637_v6 = vpop.f32.mrf.mxu0 }
 0x145   :  { %v724_v50 = vmax.f32 %v646_v37, 0.0  ;;  %v638_v52 = vadd.f32 %v1467_v39, %v637_v6  ;;  %v751_v6 = vpack.c.bf16 %v706_v10, %v705_v25  ;;  %v756_v51 = vpack.c.bf16 %v716_v24, %v715_v23 }
 0x146   :  { %v1211_v54 = vpop.f32.mrf.mxu0 }
 0x147   :  { %v659_v29 = vadd.f32 %v1211_v54, %v1467_v39  ;;  %v760_v5 = vpack.c.bf16 %v724_v50, %v723_v58  ;;  %v722_v7 = vmax.f32 %v638_v52, 0.0  ;;  %v758_v54 = vpack.c.bf16 %v720_v4, %v719_v20 }
 0x148   :  { %v650_v28 = vpop.f32.mrf.mxu0 }
 0x149   :  { %v651_v32 = vadd.f32 %v1467_v39, %v650_v28  ;;  %v727_v38 = vmax.f32 %v659_v29, 0.0  ;;  %v759_v62 = vpack.c.bf16 %v722_v7, %v721_v9  ;;  %v717_v28 = vmax.f32 %v619_v26, 0.0 }
 0x14a   :  { %v1212_v31 = vpop.f32.mrf.mxu0  ;;  %v606_v29 = vadd.f32 %v1467_v39, %v1571_v21  ;;  %v1044_v21 = vcombine.low %v1558_v1, %v1558_v1  ;;  %v1279_v1 = vld [vmem:[%s1644_s4 + $0x18] sm:$0xff]  }
 0x14b   :  { %v662_v33 = vadd.f32 %v1212_v31, %v1467_v39  ;;  %v725_v44 = vmax.f32 %v651_v32, 0.0  ;;  %v757_v30 = vpack.c.bf16 %v718_v22, %v717_v28  ;;  %v603_v31 = vadd.f32 %v1467_v39, %v1567_v19  ;;  %v1280_v19 = vld [vmem:[%s1644_s4 + $0x10] sm:$0xff]  }
 0x14c   :  { %v653_v35 = vpop.f32.mrf.mxu0  ;;  %v714_v32 = vmax.f32 %v606_v29, 0.0 }
 0x14d   :  { %v728_v40 = vmax.f32 %v662_v33, 0.0  ;;  %v654_v41 = vadd.f32 %v1467_v39, %v653_v35  ;;  %v713_v33 = vmax.f32 %v603_v31, 0.0  ;;  %v1275_v39 = vld [vmem:[%s1644_s4 + $0x38] sm:$0xff]  }
 0x14f   :  { %v762_v45 = vpack.c.bf16 %v728_v40, %v727_v38  ;;  %v726_v46 = vmax.f32 %v654_v41, 0.0  ;;  %v755_v63 = vpack.c.bf16 %v714_v32, %v713_v33 }
 0x151   :  { %v761_v55 = vpack.c.bf16 %v726_v46, %v725_v44  ;;  %1112 = vmatprep.subr.bf16.mxu1 %v762_v45 }
 0x152   :  { %1113 = vmatpush3.bf16.msra.mxu1 %v754_v48  ;;  %v1046_v48 = vld [vmem:[%s1645_s5] ss:$0 sm:$0xff] }
 0x153   :  { %1114 = vmatprep.subr.bf16.mxu1 %v761_v55 }
 0x156   :  { %1115 = vmatpush3.bf16.msra.mxu1 %v753_v0 }
 0x157   :  { %1116 = vmatprep.subr.bf16.mxu1 %v760_v5 }
 0x15a   :  { %1117 = vmatpush3.bf16.msra.mxu1 %v752_v12 }
 0x15b   :  { %1118 = vmatprep.subr.bf16.mxu1 %v759_v62 }
 0x15e   :  { %1119 = vmatpush3.bf16.msra.mxu1 %v751_v6 }
 0x15f   :  { %1120 = vmatprep.subr.bf16.mxu1 %v758_v54 }
 0x162   :  { %1121 = vmatpush3.bf16.msra.mxu1 %v1540_v53  ;;  %v1283_v53 = vmov 0.0  }
 0x163   :  { %1122 = vmatprep.subr.bf16.mxu1 %v757_v30 }
 0x166   :  { %1123 = vmatpush3.bf16.msra.mxu1 %v1546_v59  ;;  %v1276_v59 = vld [vmem:[%s1644_s4 + $0x30] sm:$0xff]  }
 0x167   :  { %1124 = vmatprep.subr.bf16.mxu1 %v756_v51 }
 0x16a   :  { %1125 = vmatpush3.bf16.msra.mxu1 %v1522_v27  ;;  %v1277_v27 = vld [vmem:[%s1644_s4 + $0x28] sm:$0xff]  }
 0x16b   :  { %1126 = vmatprep.subr.bf16.mxu1 %v755_v63 }
 0x16e   :  { %1127 = vmatpush3.bf16.msra.mxu1 %v1526_v34  ;;  %v1278_v34 = vld [vmem:[%s1644_s4 + $0x20] sm:$0xff]  }
 0x16f   :  { %1213 = vmatprep.subr.bf16.mxu1 %v1283_v53 }
 0x171   :  { %850 = vmatmul.mubr.bf16.vlgmr.msra.gmra.mxu1 %v1044_v21 }
 0x172   :  { %1214 = vmatpush3.bf16.msra.mxu1 %v1275_v39  ;;  %1229 = vmatprep.mubr.msk.bf16.mxu1 %vm1284_vm2, %v1283_v53 }
 0x173   :  { %1215 = vmatprep.subr.bf16.mxu1 %v1283_v53 }
 0x176   :  { %1216 = vmatpush3.bf16.msra.mxu1 %v1276_v59 }
 0x177   :  { %1217 = vmatprep.subr.bf16.mxu1 %v1283_v53 }
 0x17a   :  { %1218 = vmatpush3.bf16.msra.mxu1 %v1277_v27 }
 0x17b   :  { %1219 = vmatprep.subr.bf16.mxu1 %v1283_v53 }
 0x17e   :  { %1220 = vmatpush3.bf16.msra.mxu1 %v1278_v34 }
 0x17f   :  { %1221 = vmatprep.subr.bf16.mxu1 %v1283_v53 }
 0x182   :  { %1222 = vmatpush3.bf16.msra.mxu1 %v1279_v1 }
 0x183   :  { %1223 = vmatprep.subr.bf16.mxu1 %v1283_v53 }
 0x186   :  { %1224 = vmatpush3.bf16.msra.mxu1 %v1280_v19 }
 0x187   :  { %1225 = vmatprep.subr.bf16.mxu1 %v1283_v53 }
 0x18a   :  { %1226 = vmatpush3.bf16.msra.mxu1 %v1281_v3 }
 0x18b   :  { %1227 = vmatprep.subr.bf16.mxu1 %v1283_v53 }
 0x18e   :  { %1228 = vmatpush3.bf16.msra.mxu1 %v1282_v15 }
 0x1f1   :  { %v1106_v35 = vpop.f32.mrf.mxu1 }
 0x1f3   :  { %v1107_v37 = vpop.f32.mrf.mxu1 }
 0x1f4   :  { %v1108_v38 = vadd.f32 %v1107_v37, %v1106_v35 }
 0x1f5   :  { %v1109_v40 = vpop.f32.mrf.mxu1 }
 0x1f7   :  { %v1110_v41 = vpop.f32.mrf.mxu1 }
 0x231   :  { %v1128_v42 = vpop.f32.mrf.mxu1 }
 0x233   :  { %v1129_v18 = vpop.f32.mrf.mxu1 }
 0x234   :  { %v1130_v43 = vadd.f32 %v1129_v18, %v1128_v42 }
 0x235   :  { %v1131_v44 = vpop.f32.mrf.mxu1 }
 0x236   :  { %v852_v45 = vadd.f32 %v1130_v43, %v1108_v38 }
 0x237   :  { %v1132_v46 = vpop.f32.mrf.mxu1 }
 0x238   :  { %v857_v47 = vpack.c.bf16 %v852_v45, %v852_v45 }
 0x23a   :  { %1230 = vmatmul.mubr.bf16.vlgmr.msra.gmra.mxu1 %v857_v47 }
 0x2fa   :  { %v963_v49 = vpop.f32.mrf.mxu1 }
 0x2fb   :  { %v964_v50 = vadd.f32 %v1046_v48, %v963_v49 }
 0x2fc   :  { %v1231_v52 = vpop.f32.mrf.mxu1 }
 0x2fd   :  { %969 = vst [vmem:[%s1646_s6] sm:$0xff] %v964_v50 }
 0x2fe   :  { %v966_v55 = vpop.f32.mrf.mxu1 }
 0x300   :  { %v1232_v56 = vpop.f32.mrf.mxu1 }

</bundles_post_ra>
